<compile_context>
chip_gen: v7x
topology: tpu7x:2x2x1
jax: 0.10.0
libtpu: 0.0.40
codegen_flags: <defaults>
</compile_context>

<pallas_src>
import functools

import jax
import jax.numpy as jnp
from jax.experimental import pallas as pl
from jax.experimental.pallas import tpu as pltpu


def _eps_decay_kernel(slope_ref, t_ref, o_ref, *, initial_eps, end_eps):
    # slope_ref: SMEM (1,) f32 -> precomputed (end-init)/(total*decay)
    # t_ref:     SMEM (1,) f32 -> current_timestep
    # Single scalar mul-add + maximum on the TPU scalar unit.
    eps = slope_ref[0] * t_ref[0] + initial_eps
    o_ref[0] = jnp.maximum(eps, end_eps)


def make_linear_epsilon_decay(initial_eps, end_eps, total_timesteps):
    """Returns a jitted callable(current_timestep, decay_factor) -> scalar f32."""
    # Static hyperparameters folded at trace time as Python literals
    # (nothing is captured by the kernel).
    delta = float(end_eps) - float(initial_eps)
    total = float(total_timesteps)

    kernel = functools.partial(
        _eps_decay_kernel,
        initial_eps=float(initial_eps),
        end_eps=float(end_eps),
    )

    call = pl.pallas_call(
        kernel,
        out_shape=jax.ShapeDtypeStruct((1,), jnp.float32),
        in_specs=[
            pl.BlockSpec(memory_space=pltpu.SMEM),  # slope
            pl.BlockSpec(memory_space=pltpu.SMEM),  # current_timestep
        ],
        out_specs=pl.BlockSpec(memory_space=pltpu.SMEM),
        cost_estimate=pl.CostEstimate(flops=3, transcendentals=0, bytes_accessed=12),
    )

    def forward(current_timestep, decay_factor):
        t = jnp.asarray(current_timestep, jnp.float32).reshape(1)
        # Divide hoisted out of the kernel; same rounding order as the
        # PyTorch reference: (end - init) / (total * decay).
        slope = (delta / (total * jnp.asarray(decay_factor, jnp.float32))).reshape(1)
        # Reshape to scalar inside the jit: no extra slice/gather after the call.
        return call(slope, t).reshape(())

    return jax.jit(forward)


if __name__ == "__main__":
    # Module hyperparameters (from __init__): deterministic, in-script.
    initial_eps = 1.0
    end_eps = 0.05
    total_timesteps = 10_000

    # Deterministic example inputs.
    key = jax.random.PRNGKey(0)
    k_t, k_d = jax.random.split(key)
    current_timestep = jnp.floor(
        jax.random.uniform(k_t, (), minval=0.0, maxval=float(total_timesteps))
    )
    decay_factor = jax.random.uniform(k_d, (), minval=0.1, maxval=1.0)

    eps_decay = make_linear_epsilon_decay(initial_eps, end_eps, total_timesteps)
    out = eps_decay(current_timestep, decay_factor)
    jax.block_until_ready(out)

    # Pure-JAX reference check of the forward semantics.
    slope = (end_eps - initial_eps) / (total_timesteps * decay_factor)
    ref = jnp.maximum(slope * current_timestep + initial_eps, end_eps)
    assert jnp.allclose(out, ref, rtol=1e-6, atol=1e-6), (out, ref)

    print("KERNEL_OK")
</pallas_src>

<mosaic_0001>
module attributes {stable_mosaic.version = 11 : i64} {
  func.func @_eps_decay_kernel(%arg0: memref<1xf32, #tpu.memory_space<smem>>, %arg1: memref<1xf32, #tpu.memory_space<smem>>, %arg2: memref<1xf32, #tpu.memory_space<smem>>) attributes {dimension_semantics = [], scalar_prefetch = 0 : i64, scratch_operands = 0 : i64, tpu.core_type = #tpu.core_type<tc>} {
    %c0 = arith.constant 0 : index
    %0 = memref.load %arg0[%c0] : memref<1xf32, #tpu.memory_space<smem>>
    %c0_0 = arith.constant 0 : index
    %1 = memref.load %arg1[%c0_0] : memref<1xf32, #tpu.memory_space<smem>>
    %2 = arith.mulf %0, %1 : f32
    %cst = arith.constant 1.000000e+00 : f32
    %3 = arith.addf %2, %cst : f32
    %cst_1 = arith.constant 5.000000e-02 : f32
    %4 = arith.maximumf %3, %cst_1 : f32
    %c0_2 = arith.constant 0 : index
    %5 = memref.load %arg2[%c0_2] : memref<1xf32, #tpu.memory_space<smem>>
    memref.store %4, %arg2[%c0_2] : memref<1xf32, #tpu.memory_space<smem>>
    return
  }
}

</mosaic_0001>

<bundles_post_ra>
// kernel: forward.1
= control target key start
LH: loop header
LB: loop body
LE: loop exit
PB: predicated region body
PF: predicated region fallthrough
CT: control target
= control target key end

     0   :  { %9 = vsyncpa [#allocation5], 0  ;;  %s48_s15 = smov 0.05   ;;  %s83_s0 = inlined_call_operand.<no memory space> [shape: f32[1], index: 0, kind: input, shape index: {}]   ;;  %s84_s1 = inlined_call_operand.<no memory space> [shape: f32[1], index: 1, kind: input, shape index: {}]   ;;  %s85_s2 = inlined_call_operand.hbm [shape: f32[1], index: 2, kind: output, shape index: {}]  }
   0x1   :  { %s16_s13 = smul.f32 %s84_s1, %s83_s0  ;;  %s36_s19 = scalar_lea.hbm %s85_s2, 16 }
   0x2   :  { %p37_p0 = scmp.ne.s32.totalorder %s85_s2, %s36_s19  ;;  %p40_p1 = scmp.lt.u32.totalorder %s36_s19, %s85_s2 }
   0x3   :  { %s17_s14 = sadd.f32 1.0, %s16_s13 }
   0x4   :  { %p42_p2 = pnand %p40_p1, %p37_p0 }
   0x5   :  { %s18_s16 = smax.f32 %s48_s15, %s17_s14 }
   0x6   :  { %20 = sst [smem:[#allocation4]] %s18_s16 }
   0x7   :  { %45 = shalt.err (!%p42_p2)
}
   0x8   :  { %s49_s24 = smov [#allocation4]  }
   0x9   :  { %28 = dma.smem_to_hbm %s49_s24, 16, %s85_s2, [#allocation5]  }
   0xa   :  { %46 = dma.done.wait [#allocation5], 16  }
   0xb   :  { %47 = vsyncadd [#allocation5], 4294967280 }
   0xc   :  { %32 = sfence }
   0xd   :  { %33 = vsyncpa [#allocation5], 1 }

</bundles_post_ra>
